<compile_context>
chip_gen: v7x
topology: tpu7x:2x2x1
jax: 0.10.0
libtpu: 0.0.40
codegen_flags: <defaults>
</compile_context>

<pallas_src>
import functools

import jax
import jax.numpy as jnp
from jax.experimental import pallas as pl
from jax.experimental.pallas import tpu as pltpu


def _round_up(x, m):
    return (x + m - 1) // m * m


# ----------------------------- fused ANN kernel -----------------------------

def _ann_kernel(x_ref, w1_ref, b1_ref, w2_ref, b2_ref, o_ref, *, last):
    # TODO(synk): F.dropout is treated as identity (eval / inference mode).
    x = x_ref[...]
    h = jnp.dot(x, w1_ref[...], preferred_element_type=jnp.float32) + b1_ref[...]
    h = jnp.maximum(h, 0.0)                      # relu1 (stays in vregs)
    y = jnp.dot(h, w2_ref[...], preferred_element_type=jnp.float32) + b2_ref[...]
    if last is False:                            # torch: if not self.last: relu
        y = jnp.maximum(y, 0.0)
    o_ref[...] = y.astype(o_ref.dtype)


def ann_forward(params, x, *, last=False, block_rows=256):
    """x: (rows, nfeat) f32.  Returns (rows, nclass) f32."""
    w1, b1, w2, b2 = params["w1"], params["b1"], params["w2"], params["b2"]
    rows, nfeat = x.shape
    nhid = w1.shape[1]
    nclass = w2.shape[1]

    # Row tile: multiple of 8 (sublane), capped so weights + both row tiles fit
    # comfortably in VMEM even on v7x's smaller budget.
    bt = min(block_rows, _round_up(rows, 8))
    rows_pad = _round_up(rows, bt)
    if rows_pad != rows:
        x = jnp.pad(x, ((0, rows_pad - rows), (0, 0)))
    grid = (rows_pad // bt,)

    flops = 2 * rows_pad * (nfeat * nhid + nhid * nclass)
    bytes_accessed = 4 * (rows_pad * nfeat + nfeat * nhid + nhid
                          + nhid * nclass + nclass + rows_pad * nclass)

    out = pl.pallas_call(
        functools.partial(_ann_kernel, last=last),
        out_shape=jax.ShapeDtypeStruct((rows_pad, nclass), jnp.float32),
        grid_spec=pltpu.PrefetchScalarGridSpec(
            num_scalar_prefetch=0,
            grid=grid,
            in_specs=[
                pl.BlockSpec((bt, nfeat), lambda i: (i, 0)),      # x row tile
                pl.BlockSpec((nfeat, nhid), lambda i: (0, 0)),    # W1 (resident)
                pl.BlockSpec((1, nhid), lambda i: (0, 0)),        # b1
                pl.BlockSpec((nhid, nclass), lambda i: (0, 0)),   # W2 (resident)
                pl.BlockSpec((1, nclass), lambda i: (0, 0)),      # b2
            ],
            out_specs=pl.BlockSpec((bt, nclass), lambda i: (i, 0)),
        ),
        compiler_params=pltpu.CompilerParams(
            dimension_semantics=("parallel",)),
        cost_estimate=pl.CostEstimate(
            flops=flops, transcendentals=0, bytes_accessed=bytes_accessed),
    )(x, w1, b1, w2, b2)
    return out[:rows]


# ----------------------------- params / reference -----------------------------

def init_ann_params(key, nfeat, nhidden, nclass):
    """Matches torch nn.Linear default init; weights stored as (fan_in, fan_out)."""
    k1, k2, k3, k4 = jax.random.split(key, 4)
    bound1 = 1.0 / float(nfeat) ** 0.5
    bound2 = 1.0 / float(nhidden) ** 0.5
    return {
        "w1": jax.random.uniform(k1, (nfeat, nhidden), jnp.float32, -bound1, bound1),
        "b1": jax.random.uniform(k2, (1, nhidden), jnp.float32, -bound1, bound1),
        "w2": jax.random.uniform(k3, (nhidden, nclass), jnp.float32, -bound2, bound2),
        "b2": jax.random.uniform(k4, (1, nclass), jnp.float32, -bound2, bound2),
    }


def ann_reference(params, x, *, last=False):
    h = jnp.maximum(x @ params["w1"] + params["b1"], 0.0)
    y = h @ params["w2"] + params["b2"]
    if not last:
        y = jnp.maximum(y, 0.0)
    return y


# ----------------------------- demo -----------------------------

if __name__ == "__main__":
    key = jax.random.PRNGKey(0)
    rows, nfeat, nhidden, nclass = 16, 16, 32, 8
    kx, kp = jax.random.split(key)

    x = jax.random.normal(kx, (rows, nfeat), jnp.float32)
    params = init_ann_params(kp, nfeat, nhidden, nclass)

    # last=False path (final ReLU applied)
    out = jax.block_until_ready(ann_forward(params, x, last=False))
    ref = ann_reference(params, x, last=False)
    assert out.shape == (rows, nclass)
    assert bool(jnp.all(jnp.isfinite(out)))
    assert bool(jnp.allclose(out, ref, atol=1e-5, rtol=1e-5))

    # last=True path (no final ReLU)
    out_last = jax.block_until_ready(ann_forward(params, x, last=True))
    ref_last = ann_reference(params, x, last=True)
    assert bool(jnp.allclose(out_last, ref_last, atol=1e-5, rtol=1e-5))

    print("KERNEL_OK")
</pallas_src>

<mosaic_0001>
module attributes {stable_mosaic.version = 11 : i64} {
  func.func @_ann_kernel(%arg0: i32, %arg1: memref<16x16xf32, #tpu.memory_space<vmem>>, %arg2: memref<16x32xf32, #tpu.memory_space<vmem>>, %arg3: memref<1x32xf32, #tpu.memory_space<vmem>>, %arg4: memref<32x8xf32, #tpu.memory_space<vmem>>, %arg5: memref<1x8xf32, #tpu.memory_space<vmem>>, %arg6: memref<16x8xf32, #tpu.memory_space<vmem>>) attributes {dimension_semantics = [#tpu.dimension_semantics<parallel>], iteration_bounds = array<i64: 1>, scalar_prefetch = 0 : i64, scratch_operands = 0 : i64, tpu.core_type = #tpu.core_type<tc>, window_params = [{transform_indices = @transform_0, window_bounds = array<i64: 16, 16>}, {pipeline_mode = #tpu.pipeline_mode<synchronous>, transform_indices = @transform_1, window_bounds = array<i64: 16, 32>}, {pipeline_mode = #tpu.pipeline_mode<synchronous>, transform_indices = @transform_2, window_bounds = array<i64: 1, 32>}, {pipeline_mode = #tpu.pipeline_mode<synchronous>, transform_indices = @transform_3, window_bounds = array<i64: 32, 8>}, {pipeline_mode = #tpu.pipeline_mode<synchronous>, transform_indices = @transform_4, window_bounds = array<i64: 1, 8>}, {transform_indices = @transform_5, window_bounds = array<i64: 16, 8>}]} {
    %c0 = arith.constant 0 : index
    %c0_0 = arith.constant 0 : index
    %0 = vector.load %arg1[%c0, %c0_0] : memref<16x16xf32, #tpu.memory_space<vmem>>, vector<16x16xf32>
    %c0_1 = arith.constant 0 : index
    %c0_2 = arith.constant 0 : index
    %1 = vector.load %arg2[%c0_1, %c0_2] : memref<16x32xf32, #tpu.memory_space<vmem>>, vector<16x32xf32>
    %cst = arith.constant dense<0.000000e+00> : vector<16x32xf32>
    %2 = tpu.matmul %0, %1, %cst {dimension_numbers = #tpu.dot_dimension_numbers<[1], [0], [0], [1], [0, 0, 1, 1], [], []>} : vector<16x16xf32>, vector<16x32xf32>, vector<16x32xf32> -> vector<16x32xf32>
    %c0_3 = arith.constant 0 : index
    %c0_4 = arith.constant 0 : index
    %3 = vector.load %arg3[%c0_3, %c0_4] : memref<1x32xf32, #tpu.memory_space<vmem>>, vector<1x32xf32>
    %4 = vector.broadcast %3 : vector<1x32xf32> to vector<16x32xf32>
    %5 = arith.addf %2, %4 : vector<16x32xf32>
    %cst_5 = arith.constant 0.000000e+00 : f32
    %6 = vector.broadcast %cst_5 : f32 to vector<16x32xf32>
    %7 = arith.maximumf %5, %6 : vector<16x32xf32>
    %c0_6 = arith.constant 0 : index
    %c0_7 = arith.constant 0 : index
    %8 = vector.load %arg4[%c0_6, %c0_7] : memref<32x8xf32, #tpu.memory_space<vmem>>, vector<32x8xf32>
    %cst_8 = arith.constant dense<0.000000e+00> : vector<16x8xf32>
    %9 = tpu.matmul %7, %8, %cst_8 {dimension_numbers = #tpu.dot_dimension_numbers<[1], [0], [0], [1], [0, 0, 1, 1], [], []>} : vector<16x32xf32>, vector<32x8xf32>, vector<16x8xf32> -> vector<16x8xf32>
    %c0_9 = arith.constant 0 : index
    %c0_10 = arith.constant 0 : index
    %10 = vector.load %arg5[%c0_9, %c0_10] : memref<1x8xf32, #tpu.memory_space<vmem>>, vector<1x8xf32>
    %11 = vector.broadcast %10 : vector<1x8xf32> to vector<16x8xf32>
    %12 = arith.addf %9, %11 : vector<16x8xf32>
    %cst_11 = arith.constant 0.000000e+00 : f32
    %13 = vector.broadcast %cst_11 : f32 to vector<16x8xf32>
    %14 = arith.maximumf %12, %13 : vector<16x8xf32>
    %c0_12 = arith.constant 0 : index
    %c0_13 = arith.constant 0 : index
    %15 = vector.load %arg6[%c0_12, %c0_13] : memref<16x8xf32, #tpu.memory_space<vmem>>, vector<16x8xf32>
    tpu.vector_store %arg6[%c0_12, %c0_13], %14 {strides = array<i32>} : memref<16x8xf32, #tpu.memory_space<vmem>>, vector<16x8xf32>,
    return
  }
  func.func @transform_0(%arg0: i32) -> (i32, i32) {
    %c0_i32 = arith.constant 0 : i32
    %c0_i32_0 = arith.constant 0 : i32
    return %arg0, %c0_i32 : i32, i32
  }
  func.func @transform_1(%arg0: i32) -> (i32, i32) {
    %c0_i32 = arith.constant 0 : i32
    %c0_i32_0 = arith.constant 0 : i32
    %c0_i32_1 = arith.constant 0 : i32
    return %c0_i32, %c0_i32_0 : i32, i32
  }
  func.func @transform_2(%arg0: i32) -> (i32, i32) {
    %c0_i32 = arith.constant 0 : i32
    %c0_i32_0 = arith.constant 0 : i32
    %c0_i32_1 = arith.constant 0 : i32
    return %c0_i32, %c0_i32_0 : i32, i32
  }
  func.func @transform_3(%arg0: i32) -> (i32, i32) {
    %c0_i32 = arith.constant 0 : i32
    %c0_i32_0 = arith.constant 0 : i32
    %c0_i32_1 = arith.constant 0 : i32
    return %c0_i32, %c0_i32_0 : i32, i32
  }
  func.func @transform_4(%arg0: i32) -> (i32, i32) {
    %c0_i32 = arith.constant 0 : i32
    %c0_i32_0 = arith.constant 0 : i32
    %c0_i32_1 = arith.constant 0 : i32
    return %c0_i32, %c0_i32_0 : i32, i32
  }
  func.func @transform_5(%arg0: i32) -> (i32, i32) {
    %c0_i32 = arith.constant 0 : i32
    %c0_i32_0 = arith.constant 0 : i32
    return %arg0, %c0_i32 : i32, i32
  }
}

</mosaic_0001>

<bundles_post_ra>
// kernel: tpu_custom_call.1
= control target key start
LH: loop header
LB: loop body
LE: loop exit
PB: predicated region body
PF: predicated region fallthrough
CT: control target
= control target key end

     0   :  { %vm31_vm0 = vcmask 130048   ;;  %vm126_vm1 = vcmask 261120   ;;  %vm210_vm2 = vcmask 64512   ;;  %s329_s1 = inlined_call_operand.vmem [shape: f32[16,32], index: 1, kind: input, shape index: {}]   ;;  %s330_s0 = inlined_call_operand.vmem [shape: f32[16,16], index: 0, kind: input, shape index: {}]   ;;  %s331_s3 = inlined_call_operand.vmem [shape: f32[32,8], index: 3, kind: input, shape index: {}]   ;;  %s332_s2 = inlined_call_operand.vmem [shape: f32[1,32], index: 2, kind: input, shape index: {}]   ;;  %s333_s4 = inlined_call_operand.vmem [shape: f32[1,8], index: 4, kind: input, shape index: {}]   ;;  %s334_s5 = inlined_call_operand.vmem [shape: f32[16,8], index: 5, kind: output, shape index: {}]  }
   0x1   :  { %v22_v0 = vld [vmem:[%s329_s1] sm:$0xff]  ;;  %v23_v1 = vld [vmem:[%s329_s1 + $0x8] sm:$0xff]  ;;  %v117_v8 = vld [vmem:[%s331_s3 + $0x10] sm:$0xff] }
   0x2   :  { %v20_v2 = vld [vmem:[%s330_s0] sm:$0xff]  ;;  %v251_v3 = vpack.c.bf16 %v23_v1, %v22_v0  ;;  %v116_v5 = vld [vmem:[%s331_s3 + $0x8] sm:$0xff]  ;;  %v118_v9 = vld [vmem:[%s331_s3 + $0x18] sm:$0xff] }
   0x3   :  { %237 = vmatprep.mubr.msk.f32.mxu0 %vm31_vm0, %v20_v2  ;;  %v115_v4 = vld [vmem:[%s331_s3] sm:$0xff]  ;;  %v21_v7 = vld [vmem:[%s330_s0 + $0x8] sm:$0xff]  ;;  %v259_v10 = vpack.c.bf16 %v118_v9, %v117_v8 }
   0x4   :  { %v255_v6 = vpack.c.bf16 %v116_v5, %v115_v4  ;;  %252 = vmatprep.subr.bf16.mxu0 %v251_v3  ;;  %v217_v11 = vld [vmem:[%s332_s2] ss:$0 sm:$0xff] }
   0x5   :  { %254 = vmatpush3.bf16.msra.mxu0 %v251_v3  ;;  %v220_v18 = vld [vmem:[%s333_s4] ss:$0 sm:$0xff] }
   0x6   :  { %256 = vmatprep.subr.bf16.mxu1 %v255_v6 }
   0x7   :  { %258 = vmatpush3.bf16.msra.mxu1 %v255_v6 }
   0x8   :  { %238 = vmatmul.mubr.msk.f32.vlgmr.msra.gmra.mrb[0].mxu0 %vm31_vm0, %v21_v7  ;;  %260 = vmatprep.subr.bf16.mxu1 %v259_v10 }
   0xb   :  { %262 = vmatpush3.bf16.msra.mxu1 %v259_v10 }
  0xdb   :  { %v239_v12 = vpop.f32.mrb[0].mxu0 }
  0xdc   :  { %v110_v13 = vadd.f32 %v239_v12, %v217_v11  ;;  %v104_v14 = vpop.f32.mrb[1].mxu0 }
  0xdd   :  { %v105_v15 = vadd.f32 %v217_v11, %v104_v14 }
  0xde   :  { %v114_v17 = vmax.f32 %v110_v13, 0.0 }
  0xdf   :  { %v113_v16 = vmax.f32 %v105_v15, 0.0 }
  0xe1   :  { %248 = vmatprep.mubr.msk.f32.mxu1 %vm126_vm1, %v113_v16 }
  0xe2   :  { %249 = vmatmul.mubr.msk.f32.vlgmr.msra.gmra.mrb[0].mxu1 %vm126_vm1, %v114_v17 }
 0x1b5   :  { %v250_v19 = vpop.f32.mrb[0].mxu1 }
 0x1b6   :  { %v205_v20 = vadd.f32 %v250_v19, %v220_v18  ;;  %v199_v21 = vpop.f32.mrb[1].mxu1 }
 0x1b7   :  { %v200_v22 = vadd.f32 %v220_v18, %v199_v21 }
 0x1b8   :  { %v209_v23 = vmax.f32 %v205_v20, 0.0 }
 0x1b9   :  { %v208_v24 = vmax.f32 %v200_v22, 0.0 }
 0x1ba   :  { %212 = vst.msk [vmem:[%s334_s5 + $0x8] sm:$0xff] %vm210_vm2, %v209_v23 }
 0x1bb   :  { %211 = vst.msk [vmem:[%s334_s5] sm:$0xff] %vm210_vm2, %v208_v24 }

</bundles_post_ra>
